<compile_context>
chip_gen: v6e
topology: v6e:2x2x1
jax: 0.10.0
libtpu: 0.0.40
codegen_flags: <defaults>
</compile_context>

<pallas_src>
import functools

import jax
import jax.numpy as jnp
from jax.experimental import pallas as pl
from jax.experimental.pallas import tpu as pltpu

_LANES = 128           # lane width of a vreg
_SUBLANES = 8          # sublane count of a vreg
_DEFAULT_TILE_ROWS = 1024   # 1024 x 128 x 4B = 512 KiB per f32 tile


def _h_sigmoid_kernel(x_ref, o_ref):
    """x_ref/o_ref: (tile_rows, 128) tiles in VMEM (native dtype)."""
    x = x_ref[...].astype(jnp.float32)
    y = jnp.clip(x + 3.0, 0.0, 6.0) * (1.0 / 6.0)   # ReLU6(x+3)/6
    o_ref[...] = y.astype(o_ref.dtype)


def h_sigmoid(x, *, tile_rows=_DEFAULT_TILE_ROWS):
    """Elementwise h_sigmoid over an arbitrarily-shaped array.

    Internally reshapes to a lane-dense (rows_padded, 128) layout so stores
    are unmasked full-width vst, then restores the original shape/dtype.
    """
    orig_shape = x.shape
    orig_dtype = x.dtype
    n = x.size

    # Rows of 128 lanes needed to cover the flattened array.
    rows = pl.cdiv(n, _LANES)

    # Tile height: multiple of 8 sublanes, capped at tile_rows, at least
    # big enough to cover tiny inputs with a single grid step.
    rows_rounded = pl.cdiv(rows, _SUBLANES) * _SUBLANES
    tr = min(tile_rows, max(_SUBLANES, rows_rounded))

    # Pad total rows up to a multiple of the tile height.
    n_tiles = pl.cdiv(rows, tr)
    rows_padded = n_tiles * tr
    n_padded = rows_padded * _LANES

    x_flat = x.reshape(-1)
    if n_padded != n:
        x_flat = jnp.pad(x_flat, (0, n_padded - n))
    x2d = x_flat.reshape(rows_padded, _LANES)

    out2d = pl.pallas_call(
        _h_sigmoid_kernel,
        out_shape=jax.ShapeDtypeStruct((rows_padded, _LANES), orig_dtype),
        grid=(n_tiles,),
        in_specs=[pl.BlockSpec((tr, _LANES), lambda i: (i, 0))],
        out_specs=pl.BlockSpec((tr, _LANES), lambda i: (i, 0)),
        compiler_params=pltpu.CompilerParams(
            dimension_semantics=("parallel",),
        ),
    )(x2d)

    return out2d.reshape(-1)[:n].reshape(orig_shape)


def _reference(x):
    """Plain-JAX reference of the PyTorch forward: ReLU6(x + 3) / 6."""
    return jnp.clip(x + 3.0, 0.0, 6.0) / 6.0


if __name__ == "__main__":
    B, C, H, W = 2, 4, 16, 16

    key = jax.random.PRNGKey(0)
    # Scale so values land on both sides of the ReLU6 clip points (-3 and +3).
    x = 4.0 * jax.random.normal(key, (B, C, H, W), dtype=jnp.float32)

    out = h_sigmoid(x)
    out = jax.block_until_ready(out)

    ref = _reference(x)
    assert out.shape == (B, C, H, W)
    assert out.dtype == x.dtype
    assert jnp.allclose(out, ref, atol=1e-6, rtol=1e-6)

    # Also exercise a non-multiple-of-128 / odd-shaped input path.
    x2 = 4.0 * jax.random.normal(jax.random.PRNGKey(1), (3, 5, 7), dtype=jnp.float32)
    out2 = jax.block_until_ready(h_sigmoid(x2))
    assert jnp.allclose(out2, _reference(x2), atol=1e-6, rtol=1e-6)

    print("KERNEL_OK")
</pallas_src>

<mosaic_0001>
module attributes {stable_mosaic.version = 11 : i64} {
  func.func @_h_sigmoid_kernel(%arg0: i32, %arg1: memref<16x128xf32, #tpu.memory_space<vmem>>, %arg2: memref<16x128xf32, #tpu.memory_space<vmem>>) attributes {dimension_semantics = [#tpu.dimension_semantics<parallel>], iteration_bounds = array<i64: 1>, scalar_prefetch = 0 : i64, scratch_operands = 0 : i64, tpu.core_type = #tpu.core_type<tc>, window_params = [{transform_indices = @transform_0, window_bounds = array<i64: 16, 128>}, {transform_indices = @transform_1, window_bounds = array<i64: 16, 128>}]} {
    %c0 = arith.constant 0 : index
    %c0_0 = arith.constant 0 : index
    %0 = vector.load %arg1[%c0, %c0_0] : memref<16x128xf32, #tpu.memory_space<vmem>>, vector<16x128xf32>
    %cst = arith.constant 3.000000e+00 : f32
    %1 = vector.broadcast %cst : f32 to vector<16x128xf32>
    %2 = arith.addf %0, %1 : vector<16x128xf32>
    %cst_1 = arith.constant 0.000000e+00 : f32
    %cst_2 = arith.constant 6.000000e+00 : f32
    %3 = vector.broadcast %cst_1 : f32 to vector<16x128xf32>
    %4 = arith.maximumf %3, %2 : vector<16x128xf32>
    %5 = vector.broadcast %cst_2 : f32 to vector<16x128xf32>
    %6 = arith.minimumf %5, %4 : vector<16x128xf32>
    %cst_3 = arith.constant 0.166666672 : f32
    %7 = vector.broadcast %cst_3 : f32 to vector<16x128xf32>
    %8 = arith.mulf %6, %7 : vector<16x128xf32>
    %c0_4 = arith.constant 0 : index
    %c0_5 = arith.constant 0 : index
    %9 = vector.load %arg2[%c0_4, %c0_5] : memref<16x128xf32, #tpu.memory_space<vmem>>, vector<16x128xf32>
    tpu.vector_store %arg2[%c0_4, %c0_5], %8 {strides = array<i32>} : memref<16x128xf32, #tpu.memory_space<vmem>>, vector<16x128xf32>,
    return
  }
  func.func @transform_0(%arg0: i32) -> (i32, i32) {
    %c0_i32 = arith.constant 0 : i32
    %c0_i32_0 = arith.constant 0 : i32
    return %arg0, %c0_i32 : i32, i32
  }
  func.func @transform_1(%arg0: i32) -> (i32, i32) {
    %c0_i32 = arith.constant 0 : i32
    %c0_i32_0 = arith.constant 0 : i32
    return %arg0, %c0_i32 : i32, i32
  }
}

</mosaic_0001>

<bundles_post_ra>
// kernel: tpu_custom_call.1
= control target key start
LH: loop header
LB: loop body
LE: loop exit
PB: predicated region body
PF: predicated region fallthrough
CT: control target
= control target key end

     0   :  { %6 = vsyncpa [#allocation3], 0  ;;  %s126_s0 = inlined_call_operand.hbm [shape: f32[16,128], index: 0, kind: input, shape index: {}]   ;;  %s127_s1 = inlined_call_operand.hbm [shape: f32[16,128], index: 1, kind: output, shape index: {}]  }
   0x1   :  { %7 = vsyncpa [#allocation4], 0  ;;  %s100_s6 = smov [#allocation2]  }
   0x2   :  { %s13_s7 = sshll.u32 %s100_s6, 4  ;;  %s14_s7 = int_to_ptr.vmem [resolvable:$true] %s13_s7 }
   0x3   :  { %s64_s8 = scalar_lea.vmem %s14_s7, 256  ;;  %p69_p1 = scmp.lt.s32.totalorder %s14_s7, %s14_s7 }
   0x4   :  { %p65_p0 = scmp.ne.s32.totalorder %s14_s7, %s64_s8  ;;  %p70_p2 = scmp.lt.s32.totalorder %s64_s8, %s64_s8 }
   0x6   :  { %p71_p3 = por %p70_p2, %p69_p1 }
   0x8   :  { %p72_p4 = pnand %p71_p3, %p65_p0 }
   0xa   :  { %75 = shalt.err (!%p72_p4)
}
   0xb   :  { %s101_s9 = smov 128   ;;  %s102_s10 = smov 8  }
   0xc   :  { %19 = dma.hbm_to_vmem [thread:$0]  %s126_s0, 256, %s14_s7, [#allocation3], %s101_s9, %s101_s9, %s102_s10  }
   0xd   :  { %96 = dma.done.wait [#allocation3], 256  }
   0xe   :  { %97 = vsyncadd [#allocation3], 4294967040  ;;  %v23_v0 = vld [vmem:[#allocation2] sm:$0xff]  ;;  %v24_v1 = vld [vmem:[#allocation2 + $0x8] sm:$0xff]  ;;  %s103_s13 = smov [#allocation5]  }
   0xf   :  { %v25_v2 = vadd.f32 3.0, %v23_v0  ;;  %v26_v3 = vadd.f32 3.0, %v24_v1  ;;  %s40_s14 = sshll.u32 %s103_s13, 4  ;;  %s41_s14 = int_to_ptr.vmem [resolvable:$true] %s40_s14 }
  0x10   :  { %s76_s15 = scalar_lea.vmem %s41_s14, 256  ;;  %p81_p6 = scmp.lt.s32.totalorder %s41_s14, %s41_s14 }
  0x11   :  { %v27_v4 = vmax.f32 %v25_v2, 0.0  ;;  %v28_v5 = vmax.f32 %v26_v3, 0.0  ;;  %p77_p5 = scmp.ne.s32.totalorder %s41_s14, %s76_s15  ;;  %p82_p7 = scmp.lt.s32.totalorder %s76_s15, %s76_s15 }
  0x13   :  { %v29_v6 = vmin.f32 %v27_v4, 6.0  ;;  %v30_v7 = vmin.f32 %v28_v5, 6.0  ;;  %p83_p8 = por %p82_p7, %p81_p6 }
  0x15   :  { %v31_v8 = vmul.f32 0.16666667, %v29_v6  ;;  %v32_v9 = vmul.f32 0.16666667, %v30_v7  ;;  %p84_p9 = pnand %p83_p8, %p77_p5 }
  0x17   :  { %33 = vst [vmem:[#allocation5] sm:$0xff] %v31_v8  ;;  %34 = vst [vmem:[#allocation5 + $0x8] sm:$0xff] %v32_v9 }
  0x18   :  { %87 = shalt.err (!%p84_p9)
}
  0x19   :  { %46 = dma.vmem_to_hbm [thread:$0]  %s41_s14, 256, %s127_s1, [#allocation4], %s101_s9, %s101_s9, %s102_s10  }
  0x1a   :  { %98 = dma.done.wait [#allocation4], 256  }
  0x1b   :  { %99 = vsyncadd [#allocation4], 4294967040 }
  0x1c   :  { %50 = vsyncpa [#allocation3], 1 }
  0x1d   :  { %51 = vsyncpa [#allocation4], 1 }

</bundles_post_ra>
